<compile_context>
chip_gen: v6e
topology: v6e:2x2x1
jax: 0.10.0
libtpu: 0.0.40
codegen_flags: <defaults>
</compile_context>

<pallas_src>
import functools

import jax
import jax.numpy as jnp
import numpy as np
from jax.experimental import pallas as pl
from jax.experimental.pallas import tpu as pltpu


def _round_up(x: int, m: int) -> int:
    return ((x + m - 1) // m) * m


def tri_attn_comb_kernel(ht_ref, hc_ref, hp_ref,
                         w1_ref, w2_ref, w3_ref,
                         wout_ref, bias_ref, o_ref):
    # ht/hc/hp: [TB, H]   w1/w2/w3: [H, H]   wout: [1, H]   bias: [1, 1]
    res = jnp.dot(ht_ref[...], w1_ref[...], preferred_element_type=jnp.float32)
    res = res + jnp.dot(hc_ref[...], w2_ref[...],
                        preferred_element_type=jnp.float32)
    res = res + jnp.dot(hp_ref[...], w3_ref[...],
                        preferred_element_type=jnp.float32)
    res = res + bias_ref[...]                      # broadcast (1,1) -> (TB,H)
    # Final projection to 1 column: VPU multiply + lane reduce instead of an
    # N=1 MXU matmul.
    o_ref[...] = jnp.sum(res * wout_ref[...], axis=-1, keepdims=True)


@functools.partial(jax.jit, static_argnames=("batch_tile",))
def tri_attn_comb_path_ranker(h_text, h_con, h_path, w1, w2, w3, w_out, bias,
                              *, batch_tile: int = 512):
    """Pallas implementation of TriAttnCombPathRanker.forward.

    h_text, h_con, h_path: [B, H] float32
    w1, w2, w3:            [H, H] float32
    w_out:                 [H, 1] float32
    bias:                  [1]    float32
    returns:               [B, 1] float32
    """
    B, H = h_text.shape

    # Batch tile: multiple of 8 sublanes, capped so VMEM stays tiny even for
    # production batch sizes (3 inputs x 2 buffers x TB x H x 4B + weights).
    TB = min(batch_tile, _round_up(B, 8))
    B_pad = _round_up(B, TB)
    if B_pad != B:
        pad = B_pad - B
        h_text = jnp.pad(h_text, ((0, pad), (0, 0)))
        h_con = jnp.pad(h_con, ((0, pad), (0, 0)))
        h_path = jnp.pad(h_path, ((0, pad), (0, 0)))

    num_tiles = pl.cdiv(B_pad, TB)

    w_out_row = w_out.reshape(1, H)      # row layout for broadcast * + reduce
    bias_2d = bias.reshape(1, 1)

    out = pl.pallas_call(
        tri_attn_comb_kernel,
        out_shape=jax.ShapeDtypeStruct((B_pad, 1), jnp.float32),
        grid_spec=pltpu.PrefetchScalarGridSpec(
            num_scalar_prefetch=0,
            grid=(num_tiles,),
            in_specs=[
                # activations: blocked over batch, pipelined/double-buffered
                pl.BlockSpec((TB, H), lambda i: (i, 0)),
                pl.BlockSpec((TB, H), lambda i: (i, 0)),
                pl.BlockSpec((TB, H), lambda i: (i, 0)),
                # weights / bias: constant block index -> resident in VMEM
                pl.BlockSpec((H, H), lambda i: (0, 0)),
                pl.BlockSpec((H, H), lambda i: (0, 0)),
                pl.BlockSpec((H, H), lambda i: (0, 0)),
                pl.BlockSpec((1, H), lambda i: (0, 0)),
                pl.BlockSpec((1, 1), lambda i: (0, 0)),
            ],
            out_specs=pl.BlockSpec((TB, 1), lambda i: (i, 0)),
        ),
        compiler_params=pltpu.CompilerParams(
            # batch tiles are independent -> megacore-shardable on v7x
            dimension_semantics=("parallel",),
        ),
    )(h_text, h_con, h_path, w1, w2, w3, w_out_row, bias_2d)

    return out[:B]


def xavier_uniform(key, shape):
    fan_in, fan_out = shape[0], shape[1]
    bound = float(np.sqrt(6.0 / (fan_in + fan_out)))
    return jax.random.uniform(
        key, shape, dtype=jnp.float32, minval=-bound, maxval=bound
    )


def _reference(h_text, h_con, h_path, w1, w2, w3, w_out, bias):
    res = h_text @ w1 + h_con @ w2 + h_path @ w3 + bias
    return res @ w_out


if __name__ == "__main__":
    hdim = 32
    batch = 8

    key = jax.random.PRNGKey(0)
    k_w1, k_w2, k_w3, k_out, k_t, k_c, k_p = jax.random.split(key, 7)

    # Parameters (same shapes / init style as the PyTorch module)
    w1 = xavier_uniform(k_w1, (hdim, hdim))
    w2 = xavier_uniform(k_w2, (hdim, hdim))
    w3 = xavier_uniform(k_w3, (hdim, hdim))
    w_out = xavier_uniform(k_out, (hdim, 1))
    bias = jnp.zeros((1,), dtype=jnp.float32)       # constant_(bias, 0)

    # Inputs
    h_text = jax.random.normal(k_t, (batch, hdim), dtype=jnp.float32)
    h_con = jax.random.normal(k_c, (batch, hdim), dtype=jnp.float32)
    h_path = jax.random.normal(k_p, (batch, hdim), dtype=jnp.float32)

    # --- single-tile path (batch fits in one block) ---
    out = tri_attn_comb_path_ranker(h_text, h_con, h_path,
                                    w1, w2, w3, w_out, bias)
    out = jax.block_until_ready(out)
    ref = _reference(h_text, h_con, h_path, w1, w2, w3, w_out, bias)
    assert out.shape == (batch, hdim and 1), out.shape
    np.testing.assert_allclose(np.asarray(out), np.asarray(ref),
                               rtol=1e-4, atol=1e-4)

    # --- multi-tile path (exercises the batch grid + padding) ---
    batch2 = 40
    k_t2, k_c2, k_p2 = jax.random.split(jax.random.PRNGKey(1), 3)
    h_text2 = jax.random.normal(k_t2, (batch2, hdim), dtype=jnp.float32)
    h_con2 = jax.random.normal(k_c2, (batch2, hdim), dtype=jnp.float32)
    h_path2 = jax.random.normal(k_p2, (batch2, hdim), dtype=jnp.float32)

    out2 = tri_attn_comb_path_ranker(h_text2, h_con2, h_path2,
                                     w1, w2, w3, w_out, bias, batch_tile=16)
    out2 = jax.block_until_ready(out2)
    ref2 = _reference(h_text2, h_con2, h_path2, w1, w2, w3, w_out, bias)
    assert out2.shape == (batch2, 1), out2.shape
    np.testing.assert_allclose(np.asarray(out2), np.asarray(ref2),
                               rtol=1e-4, atol=1e-4)

    print("KERNEL_OK")
</pallas_src>

<mosaic_0001>
module attributes {stable_mosaic.version = 11 : i64} {
  func.func @tri_attn_comb_kernel(%arg0: i32, %arg1: memref<8x32xf32, #tpu.memory_space<vmem>>, %arg2: memref<8x32xf32, #tpu.memory_space<vmem>>, %arg3: memref<8x32xf32, #tpu.memory_space<vmem>>, %arg4: memref<32x32xf32, #tpu.memory_space<vmem>>, %arg5: memref<32x32xf32, #tpu.memory_space<vmem>>, %arg6: memref<32x32xf32, #tpu.memory_space<vmem>>, %arg7: memref<1x32xf32, #tpu.memory_space<vmem>>, %arg8: memref<1x1xf32, #tpu.memory_space<vmem>>, %arg9: memref<8x1xf32, #tpu.memory_space<vmem>>) attributes {dimension_semantics = [#tpu.dimension_semantics<parallel>], iteration_bounds = array<i64: 1>, scalar_prefetch = 0 : i64, scratch_operands = 0 : i64, tpu.core_type = #tpu.core_type<tc>, window_params = [{transform_indices = @transform_0, window_bounds = array<i64: 8, 32>}, {transform_indices = @transform_1, window_bounds = array<i64: 8, 32>}, {transform_indices = @transform_2, window_bounds = array<i64: 8, 32>}, {pipeline_mode = #tpu.pipeline_mode<synchronous>, transform_indices = @transform_3, window_bounds = array<i64: 32, 32>}, {pipeline_mode = #tpu.pipeline_mode<synchronous>, transform_indices = @transform_4, window_bounds = array<i64: 32, 32>}, {pipeline_mode = #tpu.pipeline_mode<synchronous>, transform_indices = @transform_5, window_bounds = array<i64: 32, 32>}, {pipeline_mode = #tpu.pipeline_mode<synchronous>, transform_indices = @transform_6, window_bounds = array<i64: 1, 32>}, {pipeline_mode = #tpu.pipeline_mode<synchronous>, transform_indices = @transform_7, window_bounds = array<i64: 1, 1>}, {transform_indices = @transform_8, window_bounds = array<i64: 8, 1>}]} {
    %c0 = arith.constant 0 : index
    %c0_0 = arith.constant 0 : index
    %0 = vector.load %arg1[%c0, %c0_0] : memref<8x32xf32, #tpu.memory_space<vmem>>, vector<8x32xf32>
    %c0_1 = arith.constant 0 : index
    %c0_2 = arith.constant 0 : index
    %1 = vector.load %arg4[%c0_1, %c0_2] : memref<32x32xf32, #tpu.memory_space<vmem>>, vector<32x32xf32>
    %cst = arith.constant dense<0.000000e+00> : vector<8x32xf32>
    %2 = tpu.matmul %0, %1, %cst {dimension_numbers = #tpu.dot_dimension_numbers<[1], [0], [0], [1], [0, 0, 1, 1], [], []>} : vector<8x32xf32>, vector<32x32xf32>, vector<8x32xf32> -> vector<8x32xf32>
    %c0_3 = arith.constant 0 : index
    %c0_4 = arith.constant 0 : index
    %3 = vector.load %arg2[%c0_3, %c0_4] : memref<8x32xf32, #tpu.memory_space<vmem>>, vector<8x32xf32>
    %c0_5 = arith.constant 0 : index
    %c0_6 = arith.constant 0 : index
    %4 = vector.load %arg5[%c0_5, %c0_6] : memref<32x32xf32, #tpu.memory_space<vmem>>, vector<32x32xf32>
    %cst_7 = arith.constant dense<0.000000e+00> : vector<8x32xf32>
    %5 = tpu.matmul %3, %4, %cst_7 {dimension_numbers = #tpu.dot_dimension_numbers<[1], [0], [0], [1], [0, 0, 1, 1], [], []>} : vector<8x32xf32>, vector<32x32xf32>, vector<8x32xf32> -> vector<8x32xf32>
    %6 = arith.addf %2, %5 : vector<8x32xf32>
    %c0_8 = arith.constant 0 : index
    %c0_9 = arith.constant 0 : index
    %7 = vector.load %arg3[%c0_8, %c0_9] : memref<8x32xf32, #tpu.memory_space<vmem>>, vector<8x32xf32>
    %c0_10 = arith.constant 0 : index
    %c0_11 = arith.constant 0 : index
    %8 = vector.load %arg6[%c0_10, %c0_11] : memref<32x32xf32, #tpu.memory_space<vmem>>, vector<32x32xf32>
    %cst_12 = arith.constant dense<0.000000e+00> : vector<8x32xf32>
    %9 = tpu.matmul %7, %8, %cst_12 {dimension_numbers = #tpu.dot_dimension_numbers<[1], [0], [0], [1], [0, 0, 1, 1], [], []>} : vector<8x32xf32>, vector<32x32xf32>, vector<8x32xf32> -> vector<8x32xf32>
    %10 = arith.addf %6, %9 : vector<8x32xf32>
    %c0_13 = arith.constant 0 : index
    %c0_14 = arith.constant 0 : index
    %11 = vector.load %arg8[%c0_13, %c0_14] : memref<1x1xf32, #tpu.memory_space<vmem>>, vector<1x1xf32>
    %12 = vector.broadcast %11 : vector<1x1xf32> to vector<8x32xf32>
    %13 = arith.addf %10, %12 : vector<8x32xf32>
    %c0_15 = arith.constant 0 : index
    %c0_16 = arith.constant 0 : index
    %14 = vector.load %arg7[%c0_15, %c0_16] : memref<1x32xf32, #tpu.memory_space<vmem>>, vector<1x32xf32>
    %15 = vector.broadcast %14 : vector<1x32xf32> to vector<8x32xf32>
    %16 = arith.mulf %13, %15 : vector<8x32xf32>
    %cst_17 = arith.constant dense<0.000000e+00> : vector<8xf32>
    %17 = vector.multi_reduction <add>, %16, %cst_17 [1] : vector<8x32xf32> to vector<8xf32>
    %18 = vector.shape_cast %17 : vector<8xf32> to vector<8x1xf32>
    %c0_18 = arith.constant 0 : index
    %c0_19 = arith.constant 0 : index
    %19 = vector.load %arg9[%c0_18, %c0_19] : memref<8x1xf32, #tpu.memory_space<vmem>>, vector<8x1xf32>
    tpu.vector_store %arg9[%c0_18, %c0_19], %18 {strides = array<i32>} : memref<8x1xf32, #tpu.memory_space<vmem>>, vector<8x1xf32>,
    return
  }
  func.func @transform_0(%arg0: i32) -> (i32, i32) {
    %c0_i32 = arith.constant 0 : i32
    %c0_i32_0 = arith.constant 0 : i32
    return %arg0, %c0_i32 : i32, i32
  }
  func.func @transform_1(%arg0: i32) -> (i32, i32) {
    %c0_i32 = arith.constant 0 : i32
    %c0_i32_0 = arith.constant 0 : i32
    return %arg0, %c0_i32 : i32, i32
  }
  func.func @transform_2(%arg0: i32) -> (i32, i32) {
    %c0_i32 = arith.constant 0 : i32
    %c0_i32_0 = arith.constant 0 : i32
    return %arg0, %c0_i32 : i32, i32
  }
  func.func @transform_3(%arg0: i32) -> (i32, i32) {
    %c0_i32 = arith.constant 0 : i32
    %c0_i32_0 = arith.constant 0 : i32
    %c0_i32_1 = arith.constant 0 : i32
    return %c0_i32, %c0_i32_0 : i32, i32
  }
  func.func @transform_4(%arg0: i32) -> (i32, i32) {
    %c0_i32 = arith.constant 0 : i32
    %c0_i32_0 = arith.constant 0 : i32
    %c0_i32_1 = arith.constant 0 : i32
    return %c0_i32, %c0_i32_0 : i32, i32
  }
  func.func @transform_5(%arg0: i32) -> (i32, i32) {
    %c0_i32 = arith.constant 0 : i32
    %c0_i32_0 = arith.constant 0 : i32
    %c0_i32_1 = arith.constant 0 : i32
    return %c0_i32, %c0_i32_0 : i32, i32
  }
  func.func @transform_6(%arg0: i32) -> (i32, i32) {
    %c0_i32 = arith.constant 0 : i32
    %c0_i32_0 = arith.constant 0 : i32
    %c0_i32_1 = arith.constant 0 : i32
    return %c0_i32, %c0_i32_0 : i32, i32
  }
  func.func @transform_7(%arg0: i32) -> (i32, i32) {
    %c0_i32 = arith.constant 0 : i32
    %c0_i32_0 = arith.constant 0 : i32
    %c0_i32_1 = arith.constant 0 : i32
    return %c0_i32, %c0_i32_0 : i32, i32
  }
  func.func @transform_8(%arg0: i32) -> (i32, i32) {
    %c0_i32 = arith.constant 0 : i32
    %c0_i32_0 = arith.constant 0 : i32
    return %arg0, %c0_i32 : i32, i32
  }
}

</mosaic_0001>

<bundles_post_ra>
// kernel: tri_attn_comb_path_ranker.1
= control target key start
LH: loop header
LB: loop body
LE: loop exit
PB: predicated region body
PF: predicated region fallthrough
CT: control target
= control target key end

     0   :  { %s630_s0 = inlined_call_operand.hbm [shape: f32[8,32], index: 0, kind: input, shape index: {}]   ;;  %s631_s1 = inlined_call_operand.hbm [shape: f32[8,32], index: 1, kind: input, shape index: {}]   ;;  %s632_s2 = inlined_call_operand.vmem [shape: f32[8,32], index: 2, kind: input, shape index: {}]   ;;  %s633_s3 = inlined_call_operand.hbm [shape: f32[32,32], index: 3, kind: input, shape index: {}]   ;;  %s634_s4 = inlined_call_operand.hbm [shape: f32[32,32], index: 4, kind: input, shape index: {}]   ;;  %s635_s5 = inlined_call_operand.hbm [shape: f32[32,32], index: 5, kind: input, shape index: {}]   ;;  %s636_s6 = inlined_call_operand.vmem [shape: f32[1,32], index: 6, kind: input, shape index: {}]   ;;  %s637_s7 = inlined_call_operand.<no memory space> [shape: f32[1,1], index: 7, kind: input, shape index: {}]   ;;  %s638_s8 = inlined_call_operand.vmem [shape: f32[8,1], index: 8, kind: output, shape index: {}]  }
   0x1   :  { %v13_v0 = vstv %s637_s7 }
   0x2   :  { %14 = vst [vmem:[#allocation2] sm:$0x1] %v13_v0 }
   0x3   :  { %15 = vsyncpa [#allocation4], 0 }
   0x4   :  { %16 = vsyncpa [#allocation6], 0 }
   0x5   :  { %17 = vsyncpa [#allocation9], 0  ;;  %s532_s29 = smov [#allocation5]  }
   0x6   :  { %s34_s30 = sshll.u32 %s532_s29, 4  ;;  %s35_s30 = int_to_ptr.vmem [resolvable:$true] %s34_s30 }
   0x7   :  { %s434_s9 = scalar_lea.vmem %s35_s30, 128  ;;  %p439_p1 = scmp.lt.s32.totalorder %s35_s30, %s35_s30 }
   0x8   :  { %p435_p0 = scmp.ne.s32.totalorder %s35_s30, %s434_s9  ;;  %p440_p2 = scmp.lt.s32.totalorder %s434_s9, %s434_s9 }
   0xa   :  { %p441_p3 = por %p440_p2, %p439_p1 }
   0xc   :  { %p442_p4 = pnand %p441_p3, %p435_p0 }
   0xe   :  { %445 = shalt.err (!%p442_p4)
}
   0xf   :  { %37 = dma.hbm_to_vmem [thread:$0]  %s631_s1, 128, %s35_s30, [#allocation6]  }
  0x10   :  { %s533_s12 = smov [#allocation8]   ;;  %s534_s13 = smov [#allocation3]  }
  0x11   :  { %s57_s7 = sshll.u32 %s533_s12, 4  ;;  %s24_s14 = sshll.u32 %s534_s13, 4  ;;  %s58_s7 = int_to_ptr.vmem [resolvable:$true] %s57_s7  ;;  %s25_s14 = int_to_ptr.vmem [resolvable:$true] %s24_s14 }
  0x12   :  { %s454_s15 = scalar_lea.vmem %s58_s7, 512  ;;  %p459_p6 = scmp.lt.s32.totalorder %s58_s7, %s58_s7 }
  0x13   :  { %p455_p5 = scmp.ne.s32.totalorder %s58_s7, %s454_s15  ;;  %p460_p7 = scmp.lt.s32.totalorder %s454_s15, %s454_s15 }
  0x15   :  { %p461_p8 = por %p460_p7, %p459_p6 }
  0x17   :  { %p462_p9 = pnand %p461_p8, %p455_p5 }
  0x19   :  { %465 = shalt.err (!%p462_p9)
}
  0x1a   :  { %s535_s16 = smov 128   ;;  %s536_s17 = smov 8  }
  0x1b   :  { %63 = dma.hbm_to_vmem [thread:$0]  %s634_s4, 512, %s58_s7, [#allocation9], %s535_s16, %s535_s16, %s536_s17  }
  0x1c   :  { %s474_s1 = scalar_lea.vmem %s25_s14, 128  ;;  %p479_p11 = scmp.lt.s32.totalorder %s25_s14, %s25_s14 }
  0x1d   :  { %p475_p10 = scmp.ne.s32.totalorder %s25_s14, %s474_s1  ;;  %p480_p12 = scmp.lt.s32.totalorder %s474_s1, %s474_s1 }
  0x1f   :  { %p481_p13 = por %p480_p12, %p479_p11 }
  0x21   :  { %p482_p0 = pnand %p481_p13, %p475_p10 }
  0x23   :  { %485 = shalt.err (!%p482_p0)
}
  0x24   :  { %27 = dma.hbm_to_vmem [thread:$0]  %s630_s0, 128, %s25_s14, [#allocation4]  }
  0x25   :  { %s537_s22 = smov [#allocation7]   ;;  %s538_s24 = smov [#allocation10]  }
  0x26   :  { %s45_s23 = sshll.u32 %s537_s22, 4  ;;  %s69_s25 = sshll.u32 %s538_s24, 4  ;;  %s46_s23 = int_to_ptr.vmem [resolvable:$true] %s45_s23  ;;  %s70_s25 = int_to_ptr.vmem [resolvable:$true] %s69_s25 }
  0x27   :  { %s494_s26 = scalar_lea.vmem %s46_s23, 512  ;;  %p499_p2 = scmp.lt.s32.totalorder %s46_s23, %s46_s23 }
  0x28   :  { %p495_p1 = scmp.ne.s32.totalorder %s46_s23, %s494_s26  ;;  %p500_p3 = scmp.lt.s32.totalorder %s494_s26, %s494_s26 }
  0x2a   :  { %p501_p4 = por %p500_p3, %p499_p2 }
  0x2c   :  { %p502_p5 = pnand %p501_p4, %p495_p1 }
  0x2e   :  { %505 = shalt.err (!%p502_p5)
}
  0x2f   :  { %51 = dma.hbm_to_vmem [thread:$0]  %s633_s3, 512, %s46_s23, [#allocation6], %s535_s16, %s535_s16, %s536_s17  }
  0x30   :  { %s514_s0 = scalar_lea.vmem %s70_s25, 512  ;;  %p519_p7 = scmp.lt.s32.totalorder %s70_s25, %s70_s25 }
  0x31   :  { %p515_p6 = scmp.ne.s32.totalorder %s70_s25, %s514_s0  ;;  %p520_p8 = scmp.lt.s32.totalorder %s514_s0, %s514_s0 }
  0x33   :  { %p521_p9 = por %p520_p8, %p519_p7 }
  0x35   :  { %p522_p10 = pnand %p521_p9, %p515_p6 }
  0x37   :  { %525 = shalt.err (!%p522_p10)
}
  0x38   :  { %75 = dma.hbm_to_vmem [thread:$0]  %s635_s5, 512, %s70_s25, [#allocation9], %s535_s16, %s535_s16, %s536_s17  }
  0x39   :  { %526 = dma.done.wait [#allocation4], 128  }
  0x3a   :  { %527 = vsyncadd [#allocation4], 4294967168 }
  0x3b   :  { %528 = dma.done.wait [#allocation6], 640  }
  0x3c   :  { %529 = vsyncadd [#allocation6], 4294966656 }
  0x3d   :  { %530 = dma.done.wait [#allocation9], 1024  }
  0x3e   :  { %531 = vsyncadd [#allocation9], 4294966272  ;;  %v539_v1 = vmov 0.0   ;;  %vm540_vm0 = vmmov 0   ;;  %v541_v2 = vmov 0   ;;  %v104_v3 = vld [vmem:[#allocation8 + $0x18] sm:$0xff] }
  0x3f   :  { %382 = vmatprep.subr.mxu0 %v539_v1  ;;  %393 = vmatprep.subr.mxu1 %v539_v1  ;;  %v99_v4 = vld [vmem:[#allocation7 + $0x18] sm:$0xff]  ;;  %v103_v5 = vld [vmem:[#allocation8 + $0x10] sm:$0xff]  ;;  %v102_v7 = vld [vmem:[#allocation8 + $0x8] sm:$0xff]  ;;  %vm105_vm1 = vcmask 261120   ;;  %vm353_vm2 = vcmask 7168  }
  0x40   :  { %390 = vmatprep.mubr.msk.f32.mxu0 %vm540_vm0, %v539_v1  ;;  %401 = vmatprep.mubr.msk.f32.mxu1 %vm540_vm0, %v539_v1  ;;  %v98_v6 = vld [vmem:[#allocation7 + $0x10] sm:$0xff]  ;;  %v97_v8 = vld [vmem:[#allocation7 + $0x8] sm:$0xff]  ;;  %v101_v9 = vld [vmem:[#allocation8] sm:$0xff] }
  0x41   :  { %425 = vset.pattern.permute.xlu0 %v541_v2  ;;  %383 = vmatpush3.msra.mxu0 %v104_v3  ;;  %v96_v10 = vld [vmem:[#allocation7] sm:$0xff]  ;;  %v100_v11 = vld [vmem:[#allocation5] sm:$0xff]  ;;  %v95_v12 = vld [vmem:[#allocation3] sm:$0xff] }
  0x42   :  { %394 = vmatpush3.msra.mxu1 %v99_v4  ;;  %384 = vmatprep.subr.mxu0 %v539_v1  ;;  %v256_v13 = vld [vmem:[#allocation10 + $0x18] sm:$0xff]  ;;  %v255_v14 = vld [vmem:[#allocation10 + $0x10] sm:$0xff]  ;;  %v365_v15 = vld [vmem:[#allocation2] ss:$0 sm:$0xff] }
  0x43   :  { %395 = vmatprep.subr.mxu1 %v539_v1  ;;  %385 = vmatpush3.msra.mxu0 %v103_v5  ;;  %v254_v16 = vld [vmem:[#allocation10 + $0x8] sm:$0xff]  ;;  %v253_v17 = vld [vmem:[#allocation10] sm:$0xff] }
  0x44   :  { %396 = vmatpush3.msra.mxu1 %v98_v6  ;;  %386 = vmatprep.subr.mxu0 %v539_v1  ;;  %v252_v18 = vld [vmem:[%s632_s2] sm:$0xff] }
  0x45   :  { %397 = vmatprep.subr.mxu1 %v539_v1  ;;  %387 = vmatpush3.msra.mxu0 %v102_v7  ;;  %v366_v28 = vld [vmem:[%s636_s6] ss:$0 sm:$0xff] }
  0x46   :  { %398 = vmatpush3.msra.mxu1 %v97_v8  ;;  %388 = vmatprep.subr.mxu0 %v539_v1 }
  0x47   :  { %399 = vmatprep.subr.mxu1 %v539_v1  ;;  %389 = vmatpush3.msra.mxu0 %v101_v9 }
  0x48   :  { %400 = vmatpush3.msra.mxu1 %v96_v10  ;;  %391 = vmatmul.mubr.msk.f32.vlgmr.msra.gmra.mxu0 %vm105_vm1, %v100_v11 }
  0x49   :  { %404 = vmatprep.subr.mxu0 %v539_v1  ;;  %402 = vmatmul.mubr.msk.f32.vlgmr.msra.gmra.mxu1 %vm105_vm1, %v95_v12 }
  0x4a   :  { %405 = vmatpush3.msra.mxu0 %v256_v13  ;;  %412 = vmatprep.mubr.msk.f32.mxu0 %vm540_vm0, %v539_v1 }
  0x4b   :  { %406 = vmatprep.subr.mxu0 %v539_v1  ;;  %338 = vperm.xlu0 %425, %v365_v15  }
  0x4c   :  { %407 = vmatpush3.msra.mxu0 %v255_v14 }
  0x4d   :  { %408 = vmatprep.subr.mxu0 %v539_v1 }
  0x4e   :  { %409 = vmatpush3.msra.mxu0 %v254_v16 }
  0x4f   :  { %410 = vmatprep.subr.mxu0 %v539_v1 }
  0x50   :  { %411 = vmatpush3.msra.mxu0 %v253_v17 }
  0x51   :  { %413 = vmatmul.mubr.msk.f32.vlgmr.msra.gmra.mxu0 %vm105_vm1, %v252_v18 }
  0xc6   :  { %v339_v25 = vpop.permute.xlu0 %338 }
 0x108   :  { %v175_v19 = vpop.f32.mrf.mxu0 }
 0x109   :  { %v248_v20 = vpop.f32.mrf.mxu1 }
 0x10a   :  { %v392_v21 = vpop.f32.mrf.mxu0  ;;  %v249_v23 = vadd.f32 %v248_v20, %v175_v19 }
 0x10b   :  { %v403_v22 = vpop.f32.mrf.mxu1 }
 0x111   :  { %v326_v24 = vpop.f32.mrf.mxu0 }
 0x112   :  { %v330_v26 = vadd.f32 %v326_v24, %v249_v23 }
 0x113   :  { %v414_v27 = vpop.f32.mrf.mxu0 }
 0x114   :  { %v341_v29 = vadd.f32 %v339_v25, %v330_v26 }
 0x116   :  { %v349_v30 = vmul.f32 %v366_v28, %v341_v29 }
 0x118   :  { %v350_v31 = vsel %vm105_vm1, %v349_v30, 0.0 }
 0x119   :  { %351 = vadd.xlane.f32.xlu0 %v350_v31 }
 0x1a2   :  { %v352_v32 = vpop.xlane.xlu0 %351 }
 0x1a3   :  { %354 = vst.msk [vmem:[%s638_s8] sm:$0xff] %vm353_vm2, %v352_v32 }
 0x1a4   :  { %359 = vsyncpa [#allocation4], 1 }
 0x1a5   :  { %360 = vsyncpa [#allocation6], 1 }
 0x1a6   :  { %361 = vsyncpa [#allocation9], 1 }

</bundles_post_ra>
